<compile_context>
chip_gen: v5e
topology: v5e:2x2
jax: 0.10.0
libtpu: 0.0.40
codegen_flags: <defaults>
</compile_context>

<pallas_src>
import functools

import jax
import jax.numpy as jnp
from jax import lax
from jax.experimental import pallas as pl
from jax.experimental.pallas import tpu as pltpu


# ----------------------------------------------------------------------------------
# Fused kernel: 4x (conv->relu->pool) -> LSTM -> LSTM -> Linear, all VMEM/vreg resident.
# ----------------------------------------------------------------------------------
def _fused_kernel(bslab_ref, fslab_ref, o_ref, *,
                  layout_b, layout_f, B, Co, H1, H2, lc_next):
    f32 = jnp.float32
    bf16 = jnp.bfloat16

    def getb(name):                      # static, tile-aligned slab sub-slice (bf16)
        off, (r, c) = layout_b[name]
        return bslab_ref[off:off + r, 0:c]

    def getf(name):                      # static, tile-aligned slab sub-slice (f32)
        off, (r, c) = layout_f[name]
        return fslab_ref[off:off + r, 0:c]

    def mm(a, b):                        # bf16 x bf16 MXU matmul, f32 accumulation
        return jnp.dot(a.astype(bf16), b.astype(bf16), preferred_element_type=f32)

    # ------------- PCM stack: Conv1d(k=3) + ReLU + AvgPool(k=4, s=2), x4 -------------
    n_layers = len(lc_next) + 1
    taps = getb("t1")                                   # (3*B*Cin, Lc1), batch folded
    xseq = None
    for li in range(n_layers):
        act = jnp.maximum(mm(getb(f"w{li + 1}"), taps) + getf(f"b{li + 1}"), 0.0)
        # fused avg-pool (+ next layer's zero padding) as one matmul
        pooled = mm(act, getb(f"p{li + 1}"))            # (B*Co, Lp+2*pad)  /  (B*Co, I1)
        if li < n_layers - 1:
            lcn = lc_next[li]
            # next layer's k=0,1,2 conv taps = static lane shifts of the pooled row
            taps = jnp.concatenate([pooled[:, k:k + lcn] for k in range(3)], axis=0)
        else:
            xseq = pooled                               # (B*Co, I1)

    # ------------- 2x LSTM: seq = PCM batch (B), lstm-batch = channels (Co) ----------
    def lstm(x_all, wih, whh, bias, H):
        # hoisted input projection + bias for all timesteps at once: (B*Co, 4H), f32
        xp = mm(x_all, wih) + bias
        h = jnp.zeros((Co, H), f32)
        c = jnp.zeros((Co, H), f32)
        outs = []
        for t in range(B):               # static unroll; T == B is small & static
            g = xp[t * Co:(t + 1) * Co, :] + mm(h, whh)   # (Co, 4H), gates i|f|g|o
            sg = jax.nn.sigmoid(g)       # one EUP pass over the full gate tile
            tg = jnp.tanh(g)             # one EUP pass over the full gate tile
            c = sg[:, H:2 * H] * c + sg[:, 0:H] * tg[:, 2 * H:3 * H]
            h = sg[:, 3 * H:4 * H] * jnp.tanh(c)
            outs.append(h)
        return jnp.concatenate(outs, axis=0)              # (B*Co, H)

    hs1 = lstm(xseq, getb("wih1"), getb("whh1"), getf("bl1"), H1)
    hs2 = lstm(hs1, getb("wih2"), getb("whh2"), getf("bl2"), H2)

    # ------------- fused Linear over the (B, Co*H2) flatten ---------------------------
    # out[t, o] = sum_{n,h} hs2[t*Co+n, h] * fc_w[n*H2+h, o] + fc_b[o]
    u = mm(hs2, getb("gmat")) * getb("mmask").astype(f32)   # (B*Co, Co*O)
    v = mm(u, getb("srmat"))                                 # (B*Co, O)
    rows = [jnp.sum(v[t * Co:(t + 1) * Co, :], axis=0, keepdims=True)  # VPU/XLU
            for t in range(B)]                                         # segment-sum
    o_ref[...] = jnp.concatenate(rows, axis=0) + getf("fcb")           # (B, O)


# ----------------------------------------------------------------------------------
# Wrapper-side precomputation of the structured matrices + slab packing.
# ----------------------------------------------------------------------------------
def _pool_pad_mat(Lc, Lp, pad_next):
    """(Lc, Lp + 2*pad_next): avg-pool(k=4, s=2) then zero-pad by pad_next both sides."""
    r = jnp.arange(Lc)[:, None]
    m = jnp.arange(Lp + 2 * pad_next)[None, :]
    j = m - pad_next
    valid = (m >= pad_next) & (m < Lp + pad_next)
    band = (r >= 2 * j) & (r <= 2 * j + 3)
    return jnp.where(valid & band, 0.25, 0.0).astype(jnp.float32)


def _final_pool_mat(Lc, Lp):
    r = jnp.arange(Lc)[:, None]
    j = jnp.arange(Lp)[None, :]
    return jnp.where((r >= 2 * j) & (r <= 2 * j + 3), 0.25, 0.0).astype(jnp.float32)


def _conv_block_weight(w, B):
    # w: (Co, Ci, 3) -> (B*Co, 3*B*Ci) block-diagonal-over-batch im2col weight.
    eye = jnp.eye(B, dtype=jnp.float32)
    return jnp.concatenate(
        [jnp.kron(eye, w[:, :, k].astype(jnp.float32)) for k in range(3)], axis=1)


def _lstm_cat(wih, whh, b):
    # (4,I,H)/(4,H,H)/(4,1,H) -> (I,4H)/(H,4H)/(1,4H), gate order i|f|g|o.
    I, H = wih.shape[1], wih.shape[2]
    wih_c = jnp.transpose(wih, (1, 0, 2)).reshape(I, 4 * H).astype(jnp.float32)
    whh_c = jnp.transpose(whh, (1, 0, 2)).reshape(whh.shape[1], 4 * H).astype(jnp.float32)
    b_c = b.reshape(4 * H)[None, :].astype(jnp.float32)
    return wih_c, whh_c, b_c


def _pack_slab(named_arrays, dtype, row_align):
    """Stack 2-D arrays into one lane-dense (rows, 128k) slab; return slab + layout."""
    width = max(int(a.shape[1]) for _, a in named_arrays)
    width = ((width + 127) // 128) * 128
    layout, blocks, off = {}, [], 0
    for name, a in named_arrays:
        r, c = int(a.shape[0]), int(a.shape[1])
        rp = ((r + row_align - 1) // row_align) * row_align
        layout[name] = (off, (r, c))
        blocks.append(jnp.pad(a.astype(dtype), ((0, rp - r), (0, width - c))))
        off += rp
    return jnp.concatenate(blocks, axis=0), layout


def pclstm_forward(x, params):
    B, Ci, L = x.shape
    pcm = params["pcm"]
    assert len(pcm) == 4, "PCLSTMModule has exactly 4 PCModules"
    pads = [p for (_, _, p) in pcm]

    # ---- geometry per layer ----
    Lin = L
    Lcs, Lps = [], []
    for p in pads:
        Lc = Lin + 2 * p - 2
        Lp = (Lc - 4) // 2 + 1
        Lcs.append(Lc)
        Lps.append(Lp)
        Lin = Lp

    # ---- im2col of the (padded) input, batch folded into sublanes (k, b, ci) ----
    up = jnp.pad(x, ((0, 0), (0, 0), (pads[0], pads[0]))).astype(jnp.float32)
    Lc1 = Lcs[0]
    t1 = jnp.stack([up[:, :, k:k + Lc1] for k in range(3)],
                   axis=0).reshape(3 * B * Ci, Lc1)

    bf_named = [("t1", t1)]
    f32_named = []
    for li, (w, b, _) in enumerate(pcm):
        bf_named.append((f"w{li + 1}", _conv_block_weight(w, B)))           # (B*Co, 3*B*Ci)
        f32_named.append((f"b{li + 1}", jnp.tile(b.astype(jnp.float32), B)[:, None]))
        if li < len(pcm) - 1:
            bf_named.append((f"p{li + 1}", _pool_pad_mat(Lcs[li], Lps[li], pads[li + 1])))
        else:
            bf_named.append((f"p{li + 1}", _final_pool_mat(Lcs[li], Lps[li])))

    Co4 = pcm[-1][0].shape[0]

    # ---- LSTM weights with gates concatenated ----
    wih1, whh1, bl1 = params["lstm1"][0]
    wih2, whh2, bl2 = params["lstm2"][0]
    H1, H2 = wih1.shape[-1], wih2.shape[-1]
    wih1c, whh1c, bl1c = _lstm_cat(wih1, whh1, bl1)
    wih2c, whh2c, bl2c = _lstm_cat(wih2, whh2, bl2)
    bf_named += [("wih1", wih1c), ("whh1", whh1c), ("wih2", wih2c), ("whh2", whh2c)]
    f32_named += [("bl1", bl1c), ("bl2", bl2c)]

    # ---- fused Linear operands (reshape-free flatten) ----
    fcw = params["fc_w"].astype(jnp.float32)                          # (Co4*H2, O)
    fcb = params["fc_b"].astype(jnp.float32)
    O = fcw.shape[1]
    g_mat = fcw.reshape(Co4, H2, O).transpose(1, 0, 2).reshape(H2, Co4 * O)
    m_mat = jnp.tile(jnp.repeat(jnp.eye(Co4, dtype=jnp.float32), O, axis=1), (B, 1))
    sr_mat = jnp.tile(jnp.eye(O, dtype=jnp.float32), (Co4, 1))
    bf_named += [("gmat", g_mat), ("mmask", m_mat), ("srmat", sr_mat)]
    f32_named += [("fcb", fcb[None, :])]

    # ---- pack everything into 2 lane-dense slabs (2 prologue DMAs total) ----
    bslab, layout_b = _pack_slab(bf_named, jnp.bfloat16, row_align=16)
    fslab, layout_f = _pack_slab(f32_named, jnp.float32, row_align=8)

    kernel = functools.partial(
        _fused_kernel, layout_b=layout_b, layout_f=layout_f,
        B=B, Co=Co4, H1=H1, H2=H2, lc_next=tuple(Lcs[1:]))

    return pl.pallas_call(
        kernel,
        out_shape=jax.ShapeDtypeStruct((B, O), jnp.float32),
        in_specs=[pl.BlockSpec(memory_space=pltpu.MemorySpace.VMEM),
                  pl.BlockSpec(memory_space=pltpu.MemorySpace.VMEM)],
        out_specs=pl.BlockSpec(memory_space=pltpu.MemorySpace.VMEM),
    )(bslab, fslab)


# ----------------------------------------------------------------------------------
# Pure-JAX reference (mirrors the PyTorch module, full f32).
# ----------------------------------------------------------------------------------
def pcm_ref(x, w, b, padding):
    conv = lax.conv_general_dilated(
        x, w, window_strides=(1,), padding=[(padding, padding)],
        dimension_numbers=("NCH", "OIH", "NCH")) + b[None, :, None]
    act = jnp.maximum(conv, 0.0)
    pooled = lax.reduce_window(act, 0.0, lax.add, (1, 1, 4), (1, 1, 2), "VALID") / 4.0
    return pooled


def lstm_ref(x, layer_params):
    out = x
    for (wih, whh, b) in layer_params:
        T, N, _ = out.shape
        H = wih.shape[-1]

        def step(carry, xt, wih=wih, whh=whh, b=b):
            h, c = carry
            g = (jnp.einsum("ni,kih->knh", xt, wih)
                 + jnp.einsum("nh,khj->knj", h, whh) + b)
            i_g = jax.nn.sigmoid(g[0])
            f_g = jax.nn.sigmoid(g[1])
            g_g = jnp.tanh(g[2])
            o_g = jax.nn.sigmoid(g[3])
            c = f_g * c + i_g * g_g
            h = o_g * jnp.tanh(c)
            return (h, c), h

        (_, _), hs = lax.scan(step, (jnp.zeros((N, H), jnp.float32),
                                     jnp.zeros((N, H), jnp.float32)), out)
        out = hs
    return out


def pclstm_ref(x, params):
    out = x
    for (w, b, p) in params["pcm"]:
        out = pcm_ref(out, w, b, p)
    out = lstm_ref(out, params["lstm1"])
    out = lstm_ref(out, params["lstm2"])
    B = out.shape[0]
    out = out.reshape(B, -1)
    return out @ params["fc_w"] + params["fc_b"][None, :]


# ----------------------------------------------------------------------------------
# Deterministic parameter construction + run.
# ----------------------------------------------------------------------------------
def make_params(key, Ci, L, channels, hidden1, hidden2, padding, n_out):
    ks = iter(jax.random.split(key, 32))
    params = {"pcm": []}
    cin, length = Ci, L
    for co in channels:
        w = jax.random.normal(next(ks), (co, cin, 3), jnp.float32) * 0.2
        b = jax.random.normal(next(ks), (co,), jnp.float32) * 0.1
        params["pcm"].append((w, b, padding))
        lconv = length + 2 * padding - 2
        length = (lconv - 4) // 2 + 1
        cin = co

    def lstm_layer(k, I, H):
        k1, k2, k3 = jax.random.split(k, 3)
        wih = jax.random.normal(k1, (4, I, H), jnp.float32) * 0.2
        whh = jax.random.normal(k2, (4, H, H), jnp.float32) * 0.2
        b = jax.random.normal(k3, (4, 1, H), jnp.float32) * 0.1
        return (wih, whh, b)

    params["lstm1"] = [lstm_layer(next(ks), length, hidden1)]   # input_dim = pooled length
    params["lstm2"] = [lstm_layer(next(ks), hidden1, hidden2)]
    fc_in = channels[-1] * hidden2
    params["fc_w"] = jax.random.normal(next(ks), (fc_in, n_out), jnp.float32) * 0.1
    params["fc_b"] = jax.random.normal(next(ks), (n_out,), jnp.float32) * 0.1
    return params


if __name__ == "__main__":
    key = jax.random.PRNGKey(0)
    k_x, k_p = jax.random.split(key)

    B, Ci, L = 2, 4, 128                 # input (batch, channels, length) in NCL
    channels = (8, 8, 8, 8)              # kernel_num for pcm1..pcm4
    padding = 1
    hidden1, hidden2 = 32, 16            # lstm hidden dims (num_layers = 1 each)
    n_out = 6

    x = jax.random.normal(k_x, (B, Ci, L), jnp.float32)
    params = make_params(k_p, Ci, L, channels, hidden1, hidden2, padding, n_out)

    out = jax.block_until_ready(pclstm_forward(x, params))
    ref = jax.block_until_ready(pclstm_ref(x, params))

    assert out.shape == (B, n_out), out.shape
    # bf16 MXU inputs (f32 accumulation): loosened tolerance vs the pure-f32 reference.
    assert jnp.allclose(out, ref, atol=5e-2, rtol=5e-2), float(jnp.max(jnp.abs(out - ref)))

    print("KERNEL_OK")
</pallas_src>

<mosaic_0001>
module attributes {stable_mosaic.version = 11 : i64} {
  func.func @_fused_kernel(%arg0: memref<512x128xbf16, #tpu.memory_space<vmem>>, %arg1: memref<88x128xf32, #tpu.memory_space<vmem>>, %arg2: memref<2x6xf32, #tpu.memory_space<vmem>>) attributes {dimension_semantics = [], scalar_prefetch = 0 : i64, scratch_operands = 0 : i64, tpu.core_type = #tpu.core_type<tc>} {
    %c0 = arith.constant 0 : index
    %c0_0 = arith.constant 0 : index
    %0 = vector.load %arg0[%c0, %c0_0] : memref<512x128xbf16, #tpu.memory_space<vmem>>, vector<24x128xbf16>
    %c32 = arith.constant 32 : index
    %c0_1 = arith.constant 0 : index
    %1 = vector.load %arg0[%c32, %c0_1] : memref<512x128xbf16, #tpu.memory_space<vmem>>, vector<16x24xbf16>
    %cst = arith.constant dense<0.000000e+00> : vector<16x128xf32>
    %2 = tpu.matmul %1, %0, %cst {dimension_numbers = #tpu.dot_dimension_numbers<[1], [0], [0], [1], [0, 0, 1, 1], [], []>} : vector<16x24xbf16>, vector<24x128xbf16>, vector<16x128xf32> -> vector<16x128xf32>
    %c0_2 = arith.constant 0 : index
    %c0_3 = arith.constant 0 : index
    %3 = vector.load %arg1[%c0_2, %c0_3] : memref<88x128xf32, #tpu.memory_space<vmem>>, vector<16x1xf32>
    %4 = vector.broadcast %3 : vector<16x1xf32> to vector<16x128xf32>
    %5 = arith.addf %2, %4 : vector<16x128xf32>
    %cst_4 = arith.constant 0.000000e+00 : f32
    %6 = vector.broadcast %cst_4 : f32 to vector<16x128xf32>
    %7 = arith.maximumf %5, %6 : vector<16x128xf32>
    %c48 = arith.constant 48 : index
    %c0_5 = arith.constant 0 : index
    %8 = vector.load %arg0[%c48, %c0_5] : memref<512x128xbf16, #tpu.memory_space<vmem>>, vector<128x65xbf16>
    %9 = arith.truncf %7 : vector<16x128xf32> to vector<16x128xbf16>
    %cst_6 = arith.constant dense<0.000000e+00> : vector<16x65xf32>
    %10 = tpu.matmul %9, %8, %cst_6 {dimension_numbers = #tpu.dot_dimension_numbers<[1], [0], [0], [1], [0, 0, 1, 1], [], []>} : vector<16x128xbf16>, vector<128x65xbf16>, vector<16x65xf32> -> vector<16x65xf32>
    %11 = vector.extract_strided_slice %10 {offsets = [0, 0], sizes = [16, 63], strides = [1, 1]} : vector<16x65xf32> to vector<16x63xf32>
    %12 = vector.extract_strided_slice %10 {offsets = [0, 1], sizes = [16, 63], strides = [1, 1]} : vector<16x65xf32> to vector<16x63xf32>
    %13 = vector.extract_strided_slice %10 {offsets = [0, 2], sizes = [16, 63], strides = [1, 1]} : vector<16x65xf32> to vector<16x63xf32>
    %14 = tpu.concatenate %11, %12, %13 in 0 : vector<16x63xf32>, vector<16x63xf32>, vector<16x63xf32> -> vector<48x63xf32>
    %c176 = arith.constant 176 : index
    %c0_7 = arith.constant 0 : index
    %15 = vector.load %arg0[%c176, %c0_7] : memref<512x128xbf16, #tpu.memory_space<vmem>>, vector<16x48xbf16>
    %16 = arith.truncf %14 : vector<48x63xf32> to vector<48x63xbf16>
    %cst_8 = arith.constant dense<0.000000e+00> : vector<16x63xf32>
    %17 = tpu.matmul %15, %16, %cst_8 {dimension_numbers = #tpu.dot_dimension_numbers<[1], [0], [0], [1], [0, 0, 1, 1], [], []>} : vector<16x48xbf16>, vector<48x63xbf16>, vector<16x63xf32> -> vector<16x63xf32>
    %c16 = arith.constant 16 : index
    %c0_9 = arith.constant 0 : index
    %18 = vector.load %arg1[%c16, %c0_9] : memref<88x128xf32, #tpu.memory_space<vmem>>, vector<16x1xf32>
    %19 = vector.broadcast %18 : vector<16x1xf32> to vector<16x63xf32>
    %20 = arith.addf %17, %19 : vector<16x63xf32>
    %cst_10 = arith.constant 0.000000e+00 : f32
    %21 = vector.broadcast %cst_10 : f32 to vector<16x63xf32>
    %22 = arith.maximumf %20, %21 : vector<16x63xf32>
    %c192 = arith.constant 192 : index
    %c0_11 = arith.constant 0 : index
    %23 = vector.load %arg0[%c192, %c0_11] : memref<512x128xbf16, #tpu.memory_space<vmem>>, vector<63x32xbf16>
    %24 = arith.truncf %22 : vector<16x63xf32> to vector<16x63xbf16>
    %cst_12 = arith.constant dense<0.000000e+00> : vector<16x32xf32>
    %25 = tpu.matmul %24, %23, %cst_12 {dimension_numbers = #tpu.dot_dimension_numbers<[1], [0], [0], [1], [0, 0, 1, 1], [], []>} : vector<16x63xbf16>, vector<63x32xbf16>, vector<16x32xf32> -> vector<16x32xf32>
    %26 = vector.extract_strided_slice %25 {offsets = [0, 0], sizes = [16, 30], strides = [1, 1]} : vector<16x32xf32> to vector<16x30xf32>
    %27 = vector.extract_strided_slice %25 {offsets = [0, 1], sizes = [16, 30], strides = [1, 1]} : vector<16x32xf32> to vector<16x30xf32>
    %28 = vector.extract_strided_slice %25 {offsets = [0, 2], sizes = [16, 30], strides = [1, 1]} : vector<16x32xf32> to vector<16x30xf32>
    %29 = tpu.concatenate %26, %27, %28 in 0 : vector<16x30xf32>, vector<16x30xf32>, vector<16x30xf32> -> vector<48x30xf32>
    %c256 = arith.constant 256 : index
    %c0_13 = arith.constant 0 : index
    %30 = vector.load %arg0[%c256, %c0_13] : memref<512x128xbf16, #tpu.memory_space<vmem>>, vector<16x48xbf16>
    %31 = arith.truncf %29 : vector<48x30xf32> to vector<48x30xbf16>
    %cst_14 = arith.constant dense<0.000000e+00> : vector<16x30xf32>
    %32 = tpu.matmul %30, %31, %cst_14 {dimension_numbers = #tpu.dot_dimension_numbers<[1], [0], [0], [1], [0, 0, 1, 1], [], []>} : vector<16x48xbf16>, vector<48x30xbf16>, vector<16x30xf32> -> vector<16x30xf32>
    %c32_15 = arith.constant 32 : index
    %c0_16 = arith.constant 0 : index
    %33 = vector.load %arg1[%c32_15, %c0_16] : memref<88x128xf32, #tpu.memory_space<vmem>>, vector<16x1xf32>
    %34 = vector.broadcast %33 : vector<16x1xf32> to vector<16x30xf32>
    %35 = arith.addf %32, %34 : vector<16x30xf32>
    %cst_17 = arith.constant 0.000000e+00 : f32
    %36 = vector.broadcast %cst_17 : f32 to vector<16x30xf32>
    %37 = arith.maximumf %35, %36 : vector<16x30xf32>
    %c272 = arith.constant 272 : index
    %c0_18 = arith.constant 0 : index
    %38 = vector.load %arg0[%c272, %c0_18] : memref<512x128xbf16, #tpu.memory_space<vmem>>, vector<30x16xbf16>
    %39 = arith.truncf %37 : vector<16x30xf32> to vector<16x30xbf16>
    %cst_19 = arith.constant dense<0.000000e+00> : vector<16x16xf32>
    %40 = tpu.matmul %39, %38, %cst_19 {dimension_numbers = #tpu.dot_dimension_numbers<[1], [0], [0], [1], [0, 0, 1, 1], [], []>} : vector<16x30xbf16>, vector<30x16xbf16>, vector<16x16xf32> -> vector<16x16xf32>
    %41 = vector.extract_strided_slice %40 {offsets = [0, 0], sizes = [16, 14], strides = [1, 1]} : vector<16x16xf32> to vector<16x14xf32>
    %42 = vector.extract_strided_slice %40 {offsets = [0, 1], sizes = [16, 14], strides = [1, 1]} : vector<16x16xf32> to vector<16x14xf32>
    %43 = vector.extract_strided_slice %40 {offsets = [0, 2], sizes = [16, 14], strides = [1, 1]} : vector<16x16xf32> to vector<16x14xf32>
    %44 = tpu.concatenate %41, %42, %43 in 0 : vector<16x14xf32>, vector<16x14xf32>, vector<16x14xf32> -> vector<48x14xf32>
    %c304 = arith.constant 304 : index
    %c0_20 = arith.constant 0 : index
    %45 = vector.load %arg0[%c304, %c0_20] : memref<512x128xbf16, #tpu.memory_space<vmem>>, vector<16x48xbf16>
    %46 = arith.truncf %44 : vector<48x14xf32> to vector<48x14xbf16>
    %cst_21 = arith.constant dense<0.000000e+00> : vector<16x14xf32>
    %47 = tpu.matmul %45, %46, %cst_21 {dimension_numbers = #tpu.dot_dimension_numbers<[1], [0], [0], [1], [0, 0, 1, 1], [], []>} : vector<16x48xbf16>, vector<48x14xbf16>, vector<16x14xf32> -> vector<16x14xf32>
    %c48_22 = arith.constant 48 : index
    %c0_23 = arith.constant 0 : index
    %48 = vector.load %arg1[%c48_22, %c0_23] : memref<88x128xf32, #tpu.memory_space<vmem>>, vector<16x1xf32>
    %49 = vector.broadcast %48 : vector<16x1xf32> to vector<16x14xf32>
    %50 = arith.addf %47, %49 : vector<16x14xf32>
    %cst_24 = arith.constant 0.000000e+00 : f32
    %51 = vector.broadcast %cst_24 : f32 to vector<16x14xf32>
    %52 = arith.maximumf %50, %51 : vector<16x14xf32>
    %c320 = arith.constant 320 : index
    %c0_25 = arith.constant 0 : index
    %53 = vector.load %arg0[%c320, %c0_25] : memref<512x128xbf16, #tpu.memory_space<vmem>>, vector<14x6xbf16>
    %54 = arith.truncf %52 : vector<16x14xf32> to vector<16x14xbf16>
    %cst_26 = arith.constant dense<0.000000e+00> : vector<16x6xf32>
    %55 = tpu.matmul %54, %53, %cst_26 {dimension_numbers = #tpu.dot_dimension_numbers<[1], [0], [0], [1], [0, 0, 1, 1], [], []>} : vector<16x14xbf16>, vector<14x6xbf16>, vector<16x6xf32> -> vector<16x6xf32>
    %c336 = arith.constant 336 : index
    %c0_27 = arith.constant 0 : index
    %56 = vector.load %arg0[%c336, %c0_27] : memref<512x128xbf16, #tpu.memory_space<vmem>>, vector<6x128xbf16>
    %c352 = arith.constant 352 : index
    %c0_28 = arith.constant 0 : index
    %57 = vector.load %arg0[%c352, %c0_28] : memref<512x128xbf16, #tpu.memory_space<vmem>>, vector<32x128xbf16>
    %c64 = arith.constant 64 : index
    %c0_29 = arith.constant 0 : index
    %58 = vector.load %arg1[%c64, %c0_29] : memref<88x128xf32, #tpu.memory_space<vmem>>, vector<1x128xf32>
    %59 = arith.truncf %55 : vector<16x6xf32> to vector<16x6xbf16>
    %cst_30 = arith.constant dense<0.000000e+00> : vector<16x128xf32>
    %60 = tpu.matmul %59, %56, %cst_30 {dimension_numbers = #tpu.dot_dimension_numbers<[1], [0], [0], [1], [0, 0, 1, 1], [], []>} : vector<16x6xbf16>, vector<6x128xbf16>, vector<16x128xf32> -> vector<16x128xf32>
    %61 = vector.broadcast %58 : vector<1x128xf32> to vector<16x128xf32>
    %62 = arith.addf %60, %61 : vector<16x128xf32>
    %cst_31 = arith.constant 0.000000e+00 : f32
    %63 = vector.broadcast %cst_31 : f32 to vector<8x32xf32>
    %cst_32 = arith.constant 0.000000e+00 : f32
    %64 = vector.broadcast %cst_32 : f32 to vector<8x32xf32>
    %65 = vector.extract_strided_slice %62 {offsets = [0, 0], sizes = [8, 128], strides = [1, 1]} : vector<16x128xf32> to vector<8x128xf32>
    %66 = arith.truncf %63 : vector<8x32xf32> to vector<8x32xbf16>
    %cst_33 = arith.constant dense<0.000000e+00> : vector<8x128xf32>
    %67 = tpu.matmul %66, %57, %cst_33 {dimension_numbers = #tpu.dot_dimension_numbers<[1], [0], [0], [1], [0, 0, 1, 1], [], []>} : vector<8x32xbf16>, vector<32x128xbf16>, vector<8x128xf32> -> vector<8x128xf32>
    %68 = arith.addf %65, %67 : vector<8x128xf32>
    %69 = arith.negf %68 : vector<8x128xf32>
    %70 = math.exp %69 : vector<8x128xf32>
    %cst_34 = arith.constant 1.000000e+00 : f32
    %71 = vector.broadcast %cst_34 : f32 to vector<8x128xf32>
    %72 = arith.addf %71, %70 : vector<8x128xf32>
    %73 = arith.divf %71, %72 : vector<8x128xf32>
    %74 = math.tanh %68 : vector<8x128xf32>
    %75 = vector.extract_strided_slice %73 {offsets = [0, 32], sizes = [8, 32], strides = [1, 1]} : vector<8x128xf32> to vector<8x32xf32>
    %76 = arith.mulf %75, %64 : vector<8x32xf32>
    %77 = vector.extract_strided_slice %73 {offsets = [0, 0], sizes = [8, 32], strides = [1, 1]} : vector<8x128xf32> to vector<8x32xf32>
    %78 = vector.extract_strided_slice %74 {offsets = [0, 64], sizes = [8, 32], strides = [1, 1]} : vector<8x128xf32> to vector<8x32xf32>
    %79 = arith.mulf %77, %78 : vector<8x32xf32>
    %80 = arith.addf %76, %79 : vector<8x32xf32>
    %81 = vector.extract_strided_slice %73 {offsets = [0, 96], sizes = [8, 32], strides = [1, 1]} : vector<8x128xf32> to vector<8x32xf32>
    %82 = math.tanh %80 : vector<8x32xf32>
    %83 = arith.mulf %81, %82 : vector<8x32xf32>
    %84 = vector.extract_strided_slice %62 {offsets = [8, 0], sizes = [8, 128], strides = [1, 1]} : vector<16x128xf32> to vector<8x128xf32>
    %85 = arith.truncf %83 : vector<8x32xf32> to vector<8x32xbf16>
    %cst_35 = arith.constant dense<0.000000e+00> : vector<8x128xf32>
    %86 = tpu.matmul %85, %57, %cst_35 {dimension_numbers = #tpu.dot_dimension_numbers<[1], [0], [0], [1], [0, 0, 1, 1], [], []>} : vector<8x32xbf16>, vector<32x128xbf16>, vector<8x128xf32> -> vector<8x128xf32>
    %87 = arith.addf %84, %86 : vector<8x128xf32>
    %88 = arith.negf %87 : vector<8x128xf32>
    %89 = math.exp %88 : vector<8x128xf32>
    %cst_36 = arith.constant 1.000000e+00 : f32
    %90 = vector.broadcast %cst_36 : f32 to vector<8x128xf32>
    %91 = arith.addf %90, %89 : vector<8x128xf32>
    %92 = arith.divf %90, %91 : vector<8x128xf32>
    %93 = math.tanh %87 : vector<8x128xf32>
    %94 = vector.extract_strided_slice %92 {offsets = [0, 32], sizes = [8, 32], strides = [1, 1]} : vector<8x128xf32> to vector<8x32xf32>
    %95 = arith.mulf %94, %80 : vector<8x32xf32>
    %96 = vector.extract_strided_slice %92 {offsets = [0, 0], sizes = [8, 32], strides = [1, 1]} : vector<8x128xf32> to vector<8x32xf32>
    %97 = vector.extract_strided_slice %93 {offsets = [0, 64], sizes = [8, 32], strides = [1, 1]} : vector<8x128xf32> to vector<8x32xf32>
    %98 = arith.mulf %96, %97 : vector<8x32xf32>
    %99 = arith.addf %95, %98 : vector<8x32xf32>
    %100 = vector.extract_strided_slice %92 {offsets = [0, 96], sizes = [8, 32], strides = [1, 1]} : vector<8x128xf32> to vector<8x32xf32>
    %101 = math.tanh %99 : vector<8x32xf32>
    %102 = arith.mulf %100, %101 : vector<8x32xf32>
    %103 = tpu.concatenate %83, %102 in 0 : vector<8x32xf32>, vector<8x32xf32> -> vector<16x32xf32>
    %c384 = arith.constant 384 : index
    %c0_37 = arith.constant 0 : index
    %104 = vector.load %arg0[%c384, %c0_37] : memref<512x128xbf16, #tpu.memory_space<vmem>>, vector<32x64xbf16>
    %c416 = arith.constant 416 : index
    %c0_38 = arith.constant 0 : index
    %105 = vector.load %arg0[%c416, %c0_38] : memref<512x128xbf16, #tpu.memory_space<vmem>>, vector<16x64xbf16>
    %c72 = arith.constant 72 : index
    %c0_39 = arith.constant 0 : index
    %106 = vector.load %arg1[%c72, %c0_39] : memref<88x128xf32, #tpu.memory_space<vmem>>, vector<1x64xf32>
    %107 = arith.truncf %103 : vector<16x32xf32> to vector<16x32xbf16>
    %cst_40 = arith.constant dense<0.000000e+00> : vector<16x64xf32>
    %108 = tpu.matmul %107, %104, %cst_40 {dimension_numbers = #tpu.dot_dimension_numbers<[1], [0], [0], [1], [0, 0, 1, 1], [], []>} : vector<16x32xbf16>, vector<32x64xbf16>, vector<16x64xf32> -> vector<16x64xf32>
    %109 = vector.broadcast %106 : vector<1x64xf32> to vector<16x64xf32>
    %110 = arith.addf %108, %109 : vector<16x64xf32>
    %cst_41 = arith.constant 0.000000e+00 : f32
    %111 = vector.broadcast %cst_41 : f32 to vector<8x16xf32>
    %cst_42 = arith.constant 0.000000e+00 : f32
    %112 = vector.broadcast %cst_42 : f32 to vector<8x16xf32>
    %113 = vector.extract_strided_slice %110 {offsets = [0, 0], sizes = [8, 64], strides = [1, 1]} : vector<16x64xf32> to vector<8x64xf32>
    %114 = arith.truncf %111 : vector<8x16xf32> to vector<8x16xbf16>
    %cst_43 = arith.constant dense<0.000000e+00> : vector<8x64xf32>
    %115 = tpu.matmul %114, %105, %cst_43 {dimension_numbers = #tpu.dot_dimension_numbers<[1], [0], [0], [1], [0, 0, 1, 1], [], []>} : vector<8x16xbf16>, vector<16x64xbf16>, vector<8x64xf32> -> vector<8x64xf32>
    %116 = arith.addf %113, %115 : vector<8x64xf32>
    %117 = arith.negf %116 : vector<8x64xf32>
    %118 = math.exp %117 : vector<8x64xf32>
    %cst_44 = arith.constant 1.000000e+00 : f32
    %119 = vector.broadcast %cst_44 : f32 to vector<8x64xf32>
    %120 = arith.addf %119, %118 : vector<8x64xf32>
    %121 = arith.divf %119, %120 : vector<8x64xf32>
    %122 = math.tanh %116 : vector<8x64xf32>
    %123 = vector.extract_strided_slice %121 {offsets = [0, 16], sizes = [8, 16], strides = [1, 1]} : vector<8x64xf32> to vector<8x16xf32>
    %124 = arith.mulf %123, %112 : vector<8x16xf32>
    %125 = vector.extract_strided_slice %121 {offsets = [0, 0], sizes = [8, 16], strides = [1, 1]} : vector<8x64xf32> to vector<8x16xf32>
    %126 = vector.extract_strided_slice %122 {offsets = [0, 32], sizes = [8, 16], strides = [1, 1]} : vector<8x64xf32> to vector<8x16xf32>
    %127 = arith.mulf %125, %126 : vector<8x16xf32>
    %128 = arith.addf %124, %127 : vector<8x16xf32>
    %129 = vector.extract_strided_slice %121 {offsets = [0, 48], sizes = [8, 16], strides = [1, 1]} : vector<8x64xf32> to vector<8x16xf32>
    %130 = math.tanh %128 : vector<8x16xf32>
    %131 = arith.mulf %129, %130 : vector<8x16xf32>
    %132 = vector.extract_strided_slice %110 {offsets = [8, 0], sizes = [8, 64], strides = [1, 1]} : vector<16x64xf32> to vector<8x64xf32>
    %133 = arith.truncf %131 : vector<8x16xf32> to vector<8x16xbf16>
    %cst_45 = arith.constant dense<0.000000e+00> : vector<8x64xf32>
    %134 = tpu.matmul %133, %105, %cst_45 {dimension_numbers = #tpu.dot_dimension_numbers<[1], [0], [0], [1], [0, 0, 1, 1], [], []>} : vector<8x16xbf16>, vector<16x64xbf16>, vector<8x64xf32> -> vector<8x64xf32>
    %135 = arith.addf %132, %134 : vector<8x64xf32>
    %136 = arith.negf %135 : vector<8x64xf32>
    %137 = math.exp %136 : vector<8x64xf32>
    %cst_46 = arith.constant 1.000000e+00 : f32
    %138 = vector.broadcast %cst_46 : f32 to vector<8x64xf32>
    %139 = arith.addf %138, %137 : vector<8x64xf32>
    %140 = arith.divf %138, %139 : vector<8x64xf32>
    %141 = math.tanh %135 : vector<8x64xf32>
    %142 = vector.extract_strided_slice %140 {offsets = [0, 16], sizes = [8, 16], strides = [1, 1]} : vector<8x64xf32> to vector<8x16xf32>
    %143 = arith.mulf %142, %128 : vector<8x16xf32>
    %144 = vector.extract_strided_slice %140 {offsets = [0, 0], sizes = [8, 16], strides = [1, 1]} : vector<8x64xf32> to vector<8x16xf32>
    %145 = vector.extract_strided_slice %141 {offsets = [0, 32], sizes = [8, 16], strides = [1, 1]} : vector<8x64xf32> to vector<8x16xf32>
    %146 = arith.mulf %144, %145 : vector<8x16xf32>
    %147 = arith.addf %143, %146 : vector<8x16xf32>
    %148 = vector.extract_strided_slice %140 {offsets = [0, 48], sizes = [8, 16], strides = [1, 1]} : vector<8x64xf32> to vector<8x16xf32>
    %149 = math.tanh %147 : vector<8x16xf32>
    %150 = arith.mulf %148, %149 : vector<8x16xf32>
    %151 = tpu.concatenate %131, %150 in 0 : vector<8x16xf32>, vector<8x16xf32> -> vector<16x16xf32>
    %c432 = arith.constant 432 : index
    %c0_47 = arith.constant 0 : index
    %152 = vector.load %arg0[%c432, %c0_47] : memref<512x128xbf16, #tpu.memory_space<vmem>>, vector<16x48xbf16>
    %153 = arith.truncf %151 : vector<16x16xf32> to vector<16x16xbf16>
    %cst_48 = arith.constant dense<0.000000e+00> : vector<16x48xf32>
    %154 = tpu.matmul %153, %152, %cst_48 {dimension_numbers = #tpu.dot_dimension_numbers<[1], [0], [0], [1], [0, 0, 1, 1], [], []>} : vector<16x16xbf16>, vector<16x48xbf16>, vector<16x48xf32> -> vector<16x48xf32>
    %c448 = arith.constant 448 : index
    %c0_49 = arith.constant 0 : index
    %155 = vector.load %arg0[%c448, %c0_49] : memref<512x128xbf16, #tpu.memory_space<vmem>>, vector<16x48xbf16>
    %156 = arith.extf %155 : vector<16x48xbf16> to vector<16x48xf32>
    %157 = arith.mulf %154, %156 : vector<16x48xf32>
    %c464 = arith.constant 464 : index
    %c0_50 = arith.constant 0 : index
    %158 = vector.load %arg0[%c464, %c0_50] : memref<512x128xbf16, #tpu.memory_space<vmem>>, vector<48x6xbf16>
    %159 = arith.truncf %157 : vector<16x48xf32> to vector<16x48xbf16>
    %cst_51 = arith.constant dense<0.000000e+00> : vector<16x6xf32>
    %160 = tpu.matmul %159, %158, %cst_51 {dimension_numbers = #tpu.dot_dimension_numbers<[1], [0], [0], [1], [0, 0, 1, 1], [], []>} : vector<16x48xbf16>, vector<48x6xbf16>, vector<16x6xf32> -> vector<16x6xf32>
    %161 = vector.extract_strided_slice %160 {offsets = [0, 0], sizes = [8, 6], strides = [1, 1]} : vector<16x6xf32> to vector<8x6xf32>
    %cst_52 = arith.constant dense<0.000000e+00> : vector<6xf32>
    %162 = vector.multi_reduction <add>, %161, %cst_52 [0] : vector<8x6xf32> to vector<6xf32>
    %163 = vector.shape_cast %162 : vector<6xf32> to vector<1x6xf32>
    %164 = vector.extract_strided_slice %160 {offsets = [8, 0], sizes = [8, 6], strides = [1, 1]} : vector<16x6xf32> to vector<8x6xf32>
    %cst_53 = arith.constant dense<0.000000e+00> : vector<6xf32>
    %165 = vector.multi_reduction <add>, %164, %cst_53 [0] : vector<8x6xf32> to vector<6xf32>
    %166 = vector.shape_cast %165 : vector<6xf32> to vector<1x6xf32>
    %167 = tpu.concatenate %163, %166 in 0 : vector<1x6xf32>, vector<1x6xf32> -> vector<2x6xf32>
    %c80 = arith.constant 80 : index
    %c0_54 = arith.constant 0 : index
    %168 = vector.load %arg1[%c80, %c0_54] : memref<88x128xf32, #tpu.memory_space<vmem>>, vector<1x6xf32>
    %169 = vector.broadcast %168 : vector<1x6xf32> to vector<2x6xf32>
    %170 = arith.addf %167, %169 : vector<2x6xf32>
    %c0_55 = arith.constant 0 : index
    %c0_56 = arith.constant 0 : index
    %171 = vector.load %arg2[%c0_55, %c0_56] : memref<2x6xf32, #tpu.memory_space<vmem>>, vector<2x6xf32>
    tpu.vector_store %arg2[%c0_55, %c0_56], %170 {strides = array<i32>} : memref<2x6xf32, #tpu.memory_space<vmem>>, vector<2x6xf32>,
    return
  }
}

</mosaic_0001>

<bundles_post_ra>
// kernel: tpu_custom_call.1
= control target key start
LH: loop header
LB: loop body
LE: loop exit
PB: predicated region body
PF: predicated region fallthrough
CT: control target
= control target key end

     0   :  { %7 = vsyncpa [#allocation3], 0  ;;  %s1308_s0 = inlined_call_operand.hbm [shape: bf16[512,128], index: 0, kind: input, shape index: {}]   ;;  %s1309_s1 = inlined_call_operand.hbm [shape: f32[88,128], index: 1, kind: input, shape index: {}]   ;;  %s1310_s2 = inlined_call_operand.hbm [shape: f32[2,6], index: 2, kind: output, shape index: {}]  }
   0x1   :  { %8 = vsyncpa [#allocation6], 0 }
   0x2   :  { %9 = vsyncpa [#allocation4], 0  ;;  %s14_s11 = sshll.u32 %s1308_s0, 4  ;;  %s1226_s12 = smov [#allocation2]   ;;  %s15_s11 = int_to_ptr.hbm [resolvable:$true] %s14_s11 }
   0x3   :  { %s16_s13 = sshll.u32 %s1226_s12, 4  ;;  %s27_s16 = sshll.u32 %s1309_s1, 4  ;;  %s17_s13 = int_to_ptr.vmem [resolvable:$true] %s16_s13  ;;  %s28_s16 = int_to_ptr.hbm [resolvable:$true] %s27_s16 }
   0x4   :  { %s1227_s17 = smov 64   ;;  %s1228_s18 = smov 4  }
   0x5   :  { %22 = dma.hbm_to_vmem [thread:$0]  %s15_s11, 4096, %s17_s13, [#allocation3], %s1227_s17, %s1227_s17, %s1228_s18  }
   0x6   :  { %s1229_s19 = smov [#allocation5]   ;;  %s1230_s21 = smov 128  }
   0x7   :  { %s29_s20 = sshll.u32 %s1229_s19, 4  ;;  %s1231_s22 = smov 8   ;;  %s30_s20 = int_to_ptr.vmem [resolvable:$true] %s29_s20 }
   0x8   :  { %35 = dma.hbm_to_vmem [thread:$0]  %s28_s16, 1408, %s30_s20, [#allocation6], %s1230_s21, %s1230_s21, %s1231_s22  }
   0x9   :  { %1220 = dma.done.wait [#allocation3], 4096  }
   0xa   :  { %1221 = vsyncadd [#allocation3], 4294963200 }
   0xb   :  { %1222 = dma.done.wait [#allocation6], 1408  }
   0xc   :  { %1223 = vsyncadd [#allocation6], 4294965888  ;;  %v1232_v0 = vmov 0   ;;  %v47_v1 = vld [vmem:[#allocation2 + $0x8] sm:$0xf]  ;;  %v50_v3 = vld [vmem:[#allocation5] sm:$0xff] }
   0xd   :  { %1080 = vset.pattern.permute.xlu0 %v1232_v0  ;;  %1091 = vset.pattern.permute.xlu2 %v1232_v0  ;;  %v72_v2 = vunpack.c.l.b16 %v47_v1  ;;  %v1040_v4 = vld [vmem:[#allocation2 + $0x50] sm:$0xff]  ;;  %vm80_vm0 = vcmask 1043456   ;;  %v1039_v6 = vld [vmem:[#allocation2 + $0x48] sm:$0xff]  ;;  %v1031_v8 = vld [vmem:[#allocation2] sm:$0xff]  ;;  %vm76_vm1 = vcmask 195584   ;;  %s1233_s0 = smov 126  }
   0xe   :  { %1112 = vset.pattern.permute.xlu1 %v1232_v0  ;;  %54 = vperm.xlu0 %1080, %v50_v3   ;;  %v51_v9 = vld [vmem:[#allocation5 + $0x8] sm:$0xff]  ;;  %v1038_v10 = vld [vmem:[#allocation2 + $0x40] sm:$0xff]  ;;  %v1032_v11 = vld [vmem:[#allocation2 + $0x10] sm:$0xff]  ;;  %s1234_s1 = smov 127   ;;  %vm215_vm2 = vcmask 392192   ;;  %vm271_vm3 = vcmask 1046528  }
   0xf   :  { %v74_v5 = vpack.c.b16 %v72_v2, %v72_v2  ;;  %165 = vmatpush.bf16.msra.mxu1 %v1040_v4  ;;  %v1037_v12 = vld [vmem:[#allocation2 + $0x38] sm:$0xff]  ;;  %v1036_v13 = vld [vmem:[#allocation2 + $0x30] sm:$0xff]  ;;  %v1035_v14 = vld [vmem:[#allocation2 + $0x28] sm:$0xff]  ;;  %vm272_vm4 = vcmask 1047552   ;;  %v1235_v43 = vmov 65535   ;;  %vm267_vm5 = vcmask 515072  }
  0x10   :  { %v1034_v15 = vld [vmem:[#allocation2 + $0x20] sm:$0xff]  ;;  %v1033_v16 = vld [vmem:[#allocation2 + $0x18] sm:$0xff]  ;;  %v198_v29 = vld [vmem:[#allocation5 + $0x10] sm:$0xff]  ;;  %v273_v44 = vsel %vm271_vm3, 4294967295, %v1235_v43  ;;  %vm363_vm6 = vcmask 244736   ;;  %vm447_vm7 = vcmask 113664  }
  0x11   :  { %v82_v7 = vsel %vm80_vm0, %v74_v5, 0  ;;  %202 = vperm.xlu2 %1091, %v198_v29   ;;  %v199_v30 = vld [vmem:[#allocation5 + $0x18] sm:$0xff]  ;;  %v311_v34 = vld [vmem:[#allocation5 + $0x20] sm:$0xff]  ;;  %v274_v45 = vsel %vm272_vm4, %v273_v44, 0  ;;  %v1044_v47 = vld [vmem:[#allocation2 + $0x70] sm:$0xff]  ;;  %vm480_vm8 = vcmask 1042432  }
  0x12   :  { %90 = vmatpush.bf16.msra.mxu0 %v82_v7  ;;  %v1041_v41 = vld [vmem:[#allocation2 + $0x58] sm:$0xff]  ;;  %v1043_v48 = vld [vmem:[#allocation2 + $0x68] sm:$0xff]  ;;  %v1042_v49 = vld [vmem:[#allocation2 + $0x60] sm:$0xff]  ;;  %vm476_vm9 = vcmask 48128   ;;  %s1236_s23 = smov 32   ;;  %vm510_vm14 = vcmask 261120  }
  0x13   :  { %166 = vmatpush.bf16.msra.mxu1 %v1039_v6  ;;  %v1045_v42 = vld [vmem:[#allocation2 + $0x78] sm:$0xff]  ;;  %v312_v62 = vld [vmem:[#allocation5 + $0x28] sm:$0xff]  ;;  %v403_v63 = vld [vmem:[#allocation5 + $0x30] sm:$0xff]  ;;  %s1237_s24 = smov 96   ;;  %s1238_s25 = smov 16  }
  0x14   :  { %v276_v46 = vand.u32 %v1045_v42, %v274_v45  ;;  %s1239_s26 = smov 80   ;;  %s1240_s27 = smov [#allocation7]  }
  0x15   :  { %s885_s28 = sshll.u32 %s1240_s27, 4  ;;  %s887_s3 = sshll.u32 %s1310_s2, 4  ;;  %s886_s28 = int_to_ptr.vmem [resolvable:$true] %s885_s28  ;;  %s888_s3 = int_to_ptr.hbm [resolvable:$true] %s887_s3 }
  0x16   :  { %91 = vmatpush.bf16.msra.mxu0 %v1031_v8  ;;  %59 = vperm.xlu0 %1080, %v51_v9  }
  0x17   :  { %167 = vmatpush.bf16.msra.mxu1 %v1038_v10  ;;  %282 = vmatpush.bf16.msra.mxu3 %v276_v46  ;;  %v1046_v10 = vld [vmem:[#allocation2 + $0x80] sm:$0xff] }
  0x19   :  { %906 = vmatmul.msk.bf16.vlgmr.msra.gmra.mxu0 %vm76_vm1, %v1032_v11  ;;  %207 = vperm.xlu2 %1091, %v199_v30   ;;  %v972_v11 = vld [vmem:[#allocation2 + $0x90] sm:$0xf] }
  0x1b   :  { %168 = vmatpush.bf16.msra.mxu1 %v1037_v12  ;;  %283 = vmatpush.bf16.msra.mxu3 %v1044_v47  ;;  %v1048_v12 = vld [vmem:[#allocation2 + $0x90] sm:$0x70] }
  0x1f   :  { %169 = vmatpush.bf16.msra.mxu1 %v1036_v13  ;;  %284 = vmatpush.bf16.msra.mxu3 %v1043_v48  ;;  %v973_v13 = vor.u32 %v1048_v12, %v972_v11 }
  0x21   :  { %315 = vperm.xlu2 %1091, %v311_v34  }
  0x23   :  { %170 = vmatpush.bf16.msra.mxu1 %v1035_v14  ;;  %285 = vmatpush.bf16.msra.mxu3 %v1042_v49  ;;  %v368_v14 = vsel %vm271_vm3, %v973_v13, 0 }
  0x27   :  { %171 = vmatpush.bf16.msra.mxu1 %v1034_v15  ;;  %v1047_v15 = vld [vmem:[#allocation2 + $0x88] sm:$0xff] }
  0x2b   :  { %172 = vmatpush.bf16.msra.mxu1 %v1033_v16 }
  0x6b   :  { %v203_v50 = vpop.permute.xlu2 %202 }
  0x73   :  { %v208_v53 = vpop.permute.xlu2 %207 }
  0x80   :  { %v55_v17 = vpop.permute.xlu0 %54 }
  0x88   :  { %v60_v20 = vpop.permute.xlu0 %59 }
  0x96   :  { %v93_v18 = vpop.f32.mrf.mxu0 }
  0x97   :  { %v94_v19 = vadd.f32 %v93_v18, %v55_v17  ;;  %v316_v17 = vpop.permute.xlu2 %315 }
  0x99   :  { %v98_v23 = vmax.f32 %v94_v19, 0.0 }
  0x9e   :  { %v95_v21 = vpop.f32.mrf.mxu0 }
  0x9f   :  { %v96_v22 = vadd.f32 %v95_v21, %v60_v20 }
  0xa1   :  { %v99_v24 = vmax.f32 %v96_v22, 0.0 }
  0xa3   :  { %v116_v25 = vpack.c.bf16 %v99_v24, %v98_v23 }
  0xa5   :  { %173 = vmatmul.bf16.vlgmr.msra.gmra.mxu1 %v116_v25 }
 0x122   :  { %v174_v26 = vpop.f32.mrf.mxu1 }
 0x12a   :  { %v176_v27 = vpop.f32.mrf.mxu1 }
 0x12b   :  { %v1081_v28 = vpack.i.bf16 %v176_v27, %v174_v26  ;;  %v195_v40 = vpack.c.bf16 %v176_v27, %v174_v26 }
 0x12d   :  { %1082 = vrot.lane.b32.xlu1 %v1081_v28, %s1233_s0 }
 0x135   :  { %1087 = vrot.lane.b32.xlu1 %v1081_v28, %s1234_s1  ;;  %v404_v28 = vld [vmem:[#allocation5 + $0x38] sm:$0xff] }
 0x19f   :  { %v1083_v31 = vpop.permute.xlu1 %1082 }
 0x1a0   :  { %v1085_v32 = vunpack.i.h.bf16 %v1083_v31  ;;  %v1084_v33 = vunpack.i.l.bf16 %v1083_v31 }
 0x1a2   :  { %v197_v35 = vpack.c.bf16 %v1085_v32, %v1084_v33 }
 0x1a4   :  { %224 = vmatpush.bf16.msra.mxu2 %v197_v35 }
 0x1a7   :  { %v1088_v36 = vpop.permute.xlu1 %1087 }
 0x1a8   :  { %v1090_v37 = vunpack.i.h.bf16 %v1088_v36  ;;  %v1089_v38 = vunpack.i.l.bf16 %v1088_v36 }
 0x1aa   :  { %v196_v39 = vpack.c.bf16 %v1090_v37, %v1089_v38  ;;  %v1049_v38 = vld [vmem:[#allocation2 + $0x98] sm:$0xff] }
 0x1ac   :  { %225 = vmatpush.bf16.msra.mxu2 %v196_v39  ;;  %v982_v39 = vld [vmem:[#allocation2 + $0xa0] sm:$0xf] }
 0x1b0   :  { %226 = vmatpush.bf16.msra.mxu2 %v195_v40  ;;  %v1050_v40 = vld [vmem:[#allocation2 + $0xa0] sm:$0x70] }
 0x1b3   :  { %943 = vmatmul.msk.bf16.vlgmr.msra.gmra.mxu2 %vm215_vm2, %v1041_v41  ;;  %v983_v41 = vor.u32 %v1050_v40, %v982_v39 }
 0x1b4   :  { %376 = vmatpush.bf16.msrb.mxu2 %v368_v14 }
 0x1b5   :  { %v452_v42 = vsel %vm271_vm3, %v983_v41, 0 }
 0x1b8   :  { %377 = vmatpush.bf16.msrb.mxu2 %v1047_v15 }
 0x236   :  { %v228_v51 = vpop.f32.mrf.mxu2 }
 0x237   :  { %v229_v52 = vadd.f32 %v228_v51, %v203_v50 }
 0x239   :  { %v233_v56 = vmax.f32 %v229_v52, 0.0  ;;  %v468_v52 = vld [vmem:[#allocation2 + $0xa8] sm:$0x7] }
 0x23e   :  { %v230_v54 = vpop.f32.mrf.mxu2 }
 0x23f   :  { %v231_v55 = vadd.f32 %v230_v54, %v208_v53  ;;  %v482_v53 = vsel %vm480_vm8, %v468_v52, 0  ;;  %v1052_v54 = vld [vmem:[#allocation2 + $0xb8] sm:$0xff]  ;;  %v1054_v52 = vld [vmem:[#allocation2 + $0xc8] sm:$0xff]  ;;  %vm670_vm8 = vcmask 130048  }
 0x240   :  { %491 = vmatpush.bf16.msra.mxu2 %v482_v53  ;;  %520 = vmatpush.bf16.msrb.mxu1 %v1052_v54  ;;  %v1053_v53 = vld [vmem:[#allocation2 + $0xc0] sm:$0xff] }
 0x241   :  { %v234_v57 = vmax.f32 %v231_v55, 0.0  ;;  %v1051_v55 = vld [vmem:[#allocation2 + $0xb0] sm:$0xff] }
 0x243   :  { %v243_v58 = vpack.c.bf16 %v234_v57, %v233_v56 }
 0x244   :  { %521 = vmatpush.bf16.msrb.mxu1 %v1051_v55 }
 0x245   :  { %960 = vmatmul.msk.bf16.vlgmr.msra.gmra.mxu3 %vm267_vm5, %v243_v58 }
 0x247   :  { %522 = vmatmul.bf16.vlgmr.msrb.gmra.mxu1 %v1232_v0 }
 0x2c8   :  { %v287_v59 = vpop.f32.mrf.mxu3 }
 0x2d0   :  { %v289_v60 = vpop.f32.mrf.mxu3 }
 0x2d1   :  { %v1097_v61 = vpack.i.bf16 %v289_v60, %v287_v59  ;;  %v308_v9 = vpack.c.bf16 %v289_v60, %v287_v59  ;;  %v523_v59 = vpop.f32.mrf.mxu1 }
 0x2d3   :  { %1098 = vrot.lane.b32.xlu1 %v1097_v61, %s1234_s1  ;;  %1093 = vrot.lane.b32.xlu0 %v1097_v61, %s1233_s0  ;;  %v1113_v61 = vld [vmem:[#allocation5 + $0x40] ss:$0 sm:$0xff] }
 0x2d9   :  { %v525_v60 = vpop.f32.mrf.mxu1 }
 0x2da   :  { %v1114_v60 = vld [vmem:[#allocation5 + $0x48] ss:$0 sm:$0xff] }
 0x2db   :  { %320 = vperm.xlu0 %1080, %v312_v62  }
 0x2e3   :  { %407 = vperm.xlu0 %1080, %v403_v63  }
 0x345   :  { %v1099_v1 = vpop.permute.xlu1 %1098  ;;  %v1094_v2 = vpop.permute.xlu0 %1093 }
 0x346   :  { %v1096_v3 = vunpack.i.h.bf16 %v1094_v2  ;;  %v1095_v4 = vunpack.i.l.bf16 %v1094_v2  ;;  %v1101_v5 = vunpack.i.h.bf16 %v1099_v1  ;;  %v1100_v6 = vunpack.i.l.bf16 %v1099_v1 }
 0x348   :  { %v310_v7 = vpack.c.bf16 %v1096_v3, %v1095_v4  ;;  %v309_v8 = vpack.c.bf16 %v1101_v5, %v1100_v6 }
 0x34a   :  { %336 = vmatpush.bf16.msrb.mxu0 %v310_v7 }
 0x34d   :  { %v321_v19 = vpop.permute.xlu0 %320 }
 0x34e   :  { %337 = vmatpush.bf16.msrb.mxu0 %v309_v8 }
 0x352   :  { %338 = vmatpush.bf16.msrb.mxu0 %v308_v9 }
 0x355   :  { %965 = vmatmul.msk.bf16.vlgmr.msrb.gmra.mxu0 %vm215_vm2, %v1046_v10  ;;  %v408_v44 = vpop.permute.xlu0 %407 }
 0x356   :  { %461 = vmatpush.bf16.msra.mxu0 %v452_v42 }
 0x35a   :  { %656 = vmatpush.bf16.msrb.mxu0 %v1054_v52 }
 0x35e   :  { %657 = vmatpush.bf16.msrb.mxu0 %v1053_v53 }
 0x3d2   :  { %v340_v16 = vpop.f32.mrf.mxu0 }
 0x3d3   :  { %v341_v18 = vadd.f32 %v340_v16, %v316_v17 }
 0x3d5   :  { %v345_v22 = vmax.f32 %v341_v18, 0.0 }
 0x3da   :  { %v342_v20 = vpop.f32.mrf.mxu0 }
 0x3db   :  { %v343_v21 = vadd.f32 %v342_v20, %v321_v19 }
 0x3dd   :  { %v346_v23 = vmax.f32 %v343_v21, 0.0 }
 0x3df   :  { %v351_v24 = vpack.c.bf16 %v346_v23, %v345_v22 }
 0x3e1   :  { %974 = vmatmul.msk.bf16.vlgmr.msrb.gmra.mxu2 %vm363_vm6, %v351_v24 }
 0x464   :  { %v379_v25 = vpop.f32.mrf.mxu2 }
 0x46c   :  { %v381_v26 = vpop.f32.mrf.mxu2 }
 0x46d   :  { %v1107_v27 = vpack.i.bf16 %v381_v26, %v379_v25  ;;  %v400_v37 = vpack.c.bf16 %v381_v26, %v379_v25 }
 0x46f   :  { %1108 = vrot.lane.b32.xlu2 %v1107_v27, %s1234_s1  ;;  %1103 = vrot.lane.b32.xlu1 %v1107_v27, %s1233_s0 }
 0x477   :  { %412 = vperm.xlu1 %1112, %v404_v28  }
 0x4c9   :  { %v1109_v29 = vpop.permute.xlu2 %1108 }
 0x4ca   :  { %v1111_v33 = vunpack.i.h.bf16 %v1109_v29  ;;  %v1110_v34 = vunpack.i.l.bf16 %v1109_v29 }
 0x4cc   :  { %v401_v36 = vpack.c.bf16 %v1111_v33, %v1110_v34 }
 0x4e1   :  { %v1104_v30 = vpop.permute.xlu1 %1103 }
 0x4e2   :  { %v1106_v31 = vunpack.i.h.bf16 %v1104_v30  ;;  %v1105_v32 = vunpack.i.l.bf16 %v1104_v30 }
 0x4e4   :  { %v402_v35 = vpack.c.bf16 %v1106_v31, %v1105_v32 }
 0x4e6   :  { %428 = vmatpush.bf16.msrb.mxu3 %v402_v35 }
 0x4e9   :  { %v413_v45 = vpop.permute.xlu1 %412 }
 0x4ea   :  { %429 = vmatpush.bf16.msrb.mxu3 %v401_v36 }
 0x4ee   :  { %430 = vmatpush.bf16.msrb.mxu3 %v400_v37 }
 0x4f1   :  { %979 = vmatmul.msk.bf16.vlgmr.msrb.gmra.mxu3 %vm215_vm2, %v1049_v38 }
 0x4f2   :  { %578 = vmatpush.bf16.msra.mxu3 %v1052_v54 }
 0x4f6   :  { %579 = vmatpush.bf16.msra.mxu3 %v1051_v55 }
 0x574   :  { %v432_v43 = vpop.f32.mrf.mxu3 }
 0x575   :  { %v433_v46 = vadd.f32 %v432_v43, %v408_v44 }
 0x577   :  { %v437_v49 = vmax.f32 %v433_v46, 0.0 }
 0x57c   :  { %v434_v47 = vpop.f32.mrf.mxu3 }
 0x57d   :  { %v435_v48 = vadd.f32 %v434_v47, %v413_v45 }
 0x57f   :  { %v438_v50 = vmax.f32 %v435_v48, 0.0 }
 0x581   :  { %v441_v51 = vpack.c.bf16 %v438_v50, %v437_v49 }
 0x583   :  { %984 = vmatmul.msk.bf16.vlgmr.msra.gmra.mxu0 %vm447_vm7, %v441_v51  ;;  %v1055_v51 = vld [vmem:[#allocation2 + $0xd0] sm:$0xff] }
 0x584   :  { %680 = vmatpush.bf16.msrb.mxu2 %v1055_v51  ;;  %738 = vmatpush.bf16.msra.mxu1 %v1055_v51 }
 0x600   :  { %v463_v56 = vpop.f32.mrf.mxu0 }
 0x608   :  { %v465_v57 = vpop.f32.mrf.mxu0 }
 0x609   :  { %v474_v58 = vpack.c.bf16 %v465_v57, %v463_v56 }
 0x60b   :  { %985 = vmatmul.msk.bf16.vlgmr.msra.gmra.mxu2 %vm476_vm9, %v474_v58 }
 0x61b   :  { %681 = vmatmul.bf16.vlgmr.msrb.gmra.mxu2 %v1232_v0 }
 0x68e   :  { %v493_v62 = vpop.f32.mrf.mxu2 }
 0x68f   :  { %v494_v63 = vadd.f32 %v1113_v61, %v493_v62 }
 0x691   :  { %v527_v1 = vadd.f32 %v523_v59, %v494_v63 }
 0x693   :  { %1116 = vtanh.f32 %v527_v1  ;;  %v994_v3 = vmul.f32 -1.442695, %v527_v1 }
 0x695   :  { %1118 = vpow2.f32 %v994_v3 }
 0x696   :  { %v495_v26 = vpop.f32.mrf.mxu2 }
 0x697   :  { %v496_v27 = vadd.f32 %v1113_v61, %v495_v26 }
 0x699   :  { %v1117_v2 = vpop.eup %1116 }
 0x69a   :  { %550 = vrot.lane.b32.xlu2 %v1117_v2, %s1227_s17 }
 0x69b   :  { %v1119_v4 = vpop.eup %1118 }
 0x69c   :  { %v531_v5 = vadd.f32 1.0, %v1119_v4 }
 0x69e   :  { %1120 = vrcp.f32 %v531_v5  ;;  %v543_v11 = vand.u32 2147483648, %v531_v5  ;;  %vm537_vm11 = vweird.f32 %v531_v5  ;;  %v541_v12 = vand.u32 2147483647, %v531_v5  ;;  %v682_v57 = vpop.f32.mrf.mxu2 }
 0x6a0   :  { %v544_v14 = vor.u32 1.1754944e-38, %v543_v11  ;;  %vm542_vm13 = vcmp.eq.f32.partialorder %v541_v12, 8.507059e+37 }
 0x6a4   :  { %v1121_v6 = vpop.eup %1120 }
 0x6a5   :  { %v533_v7 = vmul.f32 %v1121_v6, %v531_v5  ;;  %vm538_vm10 = vweird.f32 %v1121_v6 }
 0x6a6   :  { %vm539_vm12 = vmor %vm537_vm11, %vm538_vm10  ;;  %v684_v58 = vpop.f32.mrf.mxu2 }
 0x6a7   :  { %v534_v8 = vsub.f32 1.0, %v533_v7  ;;  %v1064_v58 = vld [vmem:[#allocation2 + $0xe0] sm:$0xff]  }
 0x6a9   :  { %v535_v9 = vmul.f32 %v1121_v6, %v534_v8 }
 0x6ab   :  { %v536_v10 = vadd.f32 %v1121_v6, %v535_v9 }
 0x6ad   :  { %v540_v13 = vsel %vm539_vm12, %v1121_v6, %v536_v10 }
 0x6ae   :  { %v545_v16 = vsel %vm542_vm13, %v544_v14, %v540_v13 }
 0x6af   :  { %v548_v18 = vmul.f32 0.0, %v545_v16 }
 0x6f4   :  { %v551_v15 = vpop.permute.xlu2 %550 }
 0x6f5   :  { %v553_v17 = vmul.f32 %v551_v15, %v545_v16 }
 0x6f7   :  { %555 = vrot.lane.b32.xlu0 %v553_v17, %s1236_s23 }
 0x769   :  { %v556_v19 = vpop.permute.xlu0 %555 }
 0x76a   :  { %v558_v20 = vadd.f32 %v556_v19, %v548_v18 }
 0x76c   :  { %1122 = vtanh.f32 %v558_v20 }
 0x772   :  { %v1123_v21 = vpop.eup %1122 }
 0x773   :  { %561 = vrot.lane.b32.xlu1 %v1123_v21, %s1227_s17 }
 0x7e5   :  { %v562_v22 = vpop.permute.xlu1 %561 }
 0x7e6   :  { %v564_v23 = vmul.f32 %v562_v22, %v545_v16 }
 0x7e8   :  { %v565_v24 = vpack.c.bf16 %v564_v23, %v564_v23 }
 0x7ea   :  { %567 = vrot.lane.b32.xlu2 %v565_v24, %s1236_s23 }
 0x844   :  { %v568_v25 = vpop.permute.xlu2 %567 }
 0x845   :  { %995 = vmatmul.msk.bf16.vlgmr.msra.gmra.mxu3 %vm510_vm14, %v568_v25 }
 0x8c8   :  { %v581_v28 = vpop.f32.mrf.mxu3 }
 0x8c9   :  { %v585_v29 = vadd.f32 %v581_v28, %v496_v27 }
 0x8cb   :  { %1124 = vtanh.f32 %v585_v29  ;;  %v996_v32 = vmul.f32 -1.442695, %v585_v29 }
 0x8cd   :  { %1126 = vpow2.f32 %v996_v32 }
 0x8d0   :  { %v583_v30 = vpop.f32.mrf.mxu3 }
 0x8d1   :  { %v1125_v31 = vpop.eup %1124 }
 0x8d2   :  { %608 = vrot.lane.b32.xlu0 %v1125_v31, %s1227_s17 }
 0x8d3   :  { %v1127_v33 = vpop.eup %1126 }
 0x8d4   :  { %v589_v34 = vadd.f32 1.0, %v1127_v33 }
 0x8d6   :  { %1128 = vrcp.f32 %v589_v34  ;;  %v601_v40 = vand.u32 2147483648, %v589_v34  ;;  %vm595_vm0 = vweird.f32 %v589_v34  ;;  %v599_v41 = vand.u32 2147483647, %v589_v34 }
 0x8d8   :  { %v602_v43 = vor.u32 1.1754944e-38, %v601_v40  ;;  %vm600_vm3 = vcmp.eq.f32.partialorder %v599_v41, 8.507059e+37 }
 0x8dc   :  { %v1129_v35 = vpop.eup %1128 }
 0x8dd   :  { %v591_v36 = vmul.f32 %v1129_v35, %v589_v34  ;;  %vm596_vm15 = vweird.f32 %v1129_v35 }
 0x8de   :  { %vm597_vm1 = vmor %vm595_vm0, %vm596_vm15 }
 0x8df   :  { %v592_v37 = vsub.f32 1.0, %v591_v36 }
 0x8e1   :  { %v593_v38 = vmul.f32 %v1129_v35, %v592_v37 }
 0x8e3   :  { %v594_v39 = vadd.f32 %v1129_v35, %v593_v38 }
 0x8e5   :  { %v598_v42 = vsel %vm597_vm1, %v1129_v35, %v594_v39 }
 0x8e6   :  { %v603_v45 = vsel %vm600_vm3, %v602_v43, %v598_v42 }
 0x8e7   :  { %v606_v47 = vmul.f32 %v603_v45, %v558_v20 }
 0x944   :  { %v609_v44 = vpop.permute.xlu0 %608 }
 0x945   :  { %v611_v46 = vmul.f32 %v609_v44, %v603_v45 }
 0x947   :  { %613 = vrot.lane.b32.xlu1 %v611_v46, %s1236_s23 }
 0x9b9   :  { %v614_v48 = vpop.permute.xlu1 %613 }
 0x9ba   :  { %v616_v49 = vadd.f32 %v614_v48, %v606_v47 }
 0x9bc   :  { %1130 = vtanh.f32 %v616_v49  ;;  %v1056_v49 = vld [vmem:[#allocation2 + $0xd8] sm:$0xff] }
 0x9bd   :  { %804 = vmatpush.bf16.msrb.mxu3 %v1056_v49 }
 0x9c2   :  { %v1131_v50 = vpop.eup %1130 }
 0x9c3   :  { %619 = vrot.lane.b32.xlu2 %v1131_v50, %s1227_s17 }
 0xa1d   :  { %v620_v54 = vpop.permute.xlu2 %619 }
 0xa1e   :  { %v622_v55 = vmul.f32 %v620_v54, %v603_v45  ;;  %v1059_v54 = vld [vmem:[#allocation2 + $0xf8] sm:$0xff] }
 0xa1f   :  { %850 = vmatpush.bf16.msra.mxu0 %v1059_v54 }
 0xa20   :  { %v630_v56 = vpack.c.bf16 %v622_v55, %v564_v23  ;;  %v1058_v55 = vld [vmem:[#allocation2 + $0xf0] sm:$0xff] }
 0xa22   :  { %633 = vrot.lane.b32.xlu0 %v630_v56, %s1236_s23  ;;  %v1057_v56 = vld [vmem:[#allocation2 + $0xe8] sm:$0xff] }
 0xa23   :  { %851 = vmatpush.bf16.msra.mxu0 %v1058_v55 }
 0xa27   :  { %852 = vmatpush.bf16.msra.mxu0 %v1057_v56 }
 0xa94   :  { %v634_v59 = vpop.permute.xlu0 %633 }
 0xa95   :  { %1005 = vmatmul.msk.bf16.vlgmr.msrb.gmra.mxu0 %vm510_vm14, %v634_v59  ;;  %v1062_v59 = vunpack.c.l.bf16 %v1064_v58  ;;  %vm873_vm14 = vcmask 1040384  }
 0xb12   :  { %v659_v61 = vpop.f32.mrf.mxu0 }
 0xb13   :  { %v660_v62 = vadd.f32 %v1114_v60, %v659_v61 }
 0xb15   :  { %v686_v63 = vadd.f32 %v682_v57, %v660_v62 }
 0xb17   :  { %1132 = vtanh.f32 %v686_v63  ;;  %v1010_v0 = vmul.f32 -1.442695, %v686_v63 }
 0xb19   :  { %1134 = vpow2.f32 %v1010_v0 }
 0xb1a   :  { %v661_v24 = vpop.f32.mrf.mxu0 }
 0xb1b   :  { %v662_v25 = vadd.f32 %v1114_v60, %v661_v24  ;;  %v1063_v60 = vunpack.c.h.bf16 %v1064_v58 }
 0xb1d   :  { %v1133_v1 = vpop.eup %1132 }
 0xb1e   :  { %709 = vrot.lane.b32.xlu1 %v1133_v1, %s1237_s24 }
 0xb1f   :  { %v1135_v2 = vpop.eup %1134 }
 0xb20   :  { %v690_v3 = vadd.f32 1.0, %v1135_v2 }
 0xb22   :  { %1136 = vrcp.f32 %v690_v3  ;;  %v702_v9 = vand.u32 2147483648, %v690_v3  ;;  %vm696_vm5 = vweird.f32 %v690_v3  ;;  %v700_v10 = vand.u32 2147483647, %v690_v3 }
 0xb24   :  { %v703_v12 = vor.u32 1.1754944e-38, %v702_v9  ;;  %vm701_vm7 = vcmp.eq.f32.partialorder %v700_v10, 8.507059e+37 }
 0xb28   :  { %v1137_v4 = vpop.eup %1136 }
 0xb29   :  { %v692_v5 = vmul.f32 %v1137_v4, %v690_v3  ;;  %vm697_vm4 = vweird.f32 %v1137_v4 }
 0xb2a   :  { %vm698_vm6 = vmor %vm696_vm5, %vm697_vm4 }
 0xb2b   :  { %v693_v6 = vsub.f32 1.0, %v692_v5 }
 0xb2d   :  { %v694_v7 = vmul.f32 %v1137_v4, %v693_v6 }
 0xb2f   :  { %v695_v8 = vadd.f32 %v1137_v4, %v694_v7 }
 0xb31   :  { %v699_v11 = vsel %vm698_vm6, %v1137_v4, %v695_v8 }
 0xb32   :  { %v704_v14 = vsel %vm701_vm7, %v703_v12, %v699_v11 }
 0xb33   :  { %v707_v16 = vmul.f32 0.0, %v704_v14 }
 0xb90   :  { %v710_v13 = vpop.permute.xlu1 %709 }
 0xb91   :  { %v712_v15 = vmul.f32 %v710_v13, %v704_v14 }
 0xb93   :  { %714 = vrot.lane.b32.xlu2 %v712_v15, %s1238_s25  ;;  %v1115_v15 = vld [vmem:[#allocation5 + $0x50] ss:$0 sm:$0xff] }
 0xbed   :  { %v715_v17 = vpop.permute.xlu2 %714 }
 0xbee   :  { %v717_v18 = vadd.f32 %v715_v17, %v707_v16 }
 0xbf0   :  { %1138 = vtanh.f32 %v717_v18 }
 0xbf6   :  { %v1139_v19 = vpop.eup %1138 }
 0xbf7   :  { %720 = vrot.lane.b32.xlu0 %v1139_v19, %s1236_s23 }
 0xc69   :  { %v721_v20 = vpop.permute.xlu0 %720 }
 0xc6a   :  { %v723_v21 = vmul.f32 %v721_v20, %v704_v14 }
 0xc6c   :  { %v724_v22 = vpack.c.bf16 %v723_v21, %v723_v21 }
 0xc6e   :  { %726 = vrot.lane.b32.xlu1 %v724_v22, %s1239_s26 }
 0xce0   :  { %v727_v23 = vpop.permute.xlu1 %726 }
 0xce1   :  { %1011 = vmatmul.msk.bf16.vlgmr.msra.gmra.mxu1 %vm670_vm8, %v727_v23 }
 0xd5e   :  { %v740_v26 = vpop.f32.mrf.mxu1 }
 0xd5f   :  { %v744_v27 = vadd.f32 %v740_v26, %v662_v25 }
 0xd61   :  { %1140 = vtanh.f32 %v744_v27  ;;  %v1012_v30 = vmul.f32 -1.442695, %v744_v27 }
 0xd63   :  { %1142 = vpow2.f32 %v1012_v30 }
 0xd66   :  { %v742_v28 = vpop.f32.mrf.mxu1 }
 0xd67   :  { %v1141_v29 = vpop.eup %1140 }
 0xd68   :  { %767 = vrot.lane.b32.xlu2 %v1141_v29, %s1237_s24 }
 0xd69   :  { %v1143_v31 = vpop.eup %1142 }
 0xd6a   :  { %v748_v32 = vadd.f32 1.0, %v1143_v31 }
 0xd6c   :  { %1144 = vrcp.f32 %v748_v32  ;;  %v760_v38 = vand.u32 2147483648, %v748_v32  ;;  %vm754_vm11 = vweird.f32 %v748_v32  ;;  %v758_v39 = vand.u32 2147483647, %v748_v32 }
 0xd6e   :  { %v761_v41 = vor.u32 1.1754944e-38, %v760_v38  ;;  %vm759_vm13 = vcmp.eq.f32.partialorder %v758_v39, 8.507059e+37 }
 0xd72   :  { %v1145_v33 = vpop.eup %1144 }
 0xd73   :  { %v750_v34 = vmul.f32 %v1145_v33, %v748_v32  ;;  %vm755_vm10 = vweird.f32 %v1145_v33 }
 0xd74   :  { %vm756_vm12 = vmor %vm754_vm11, %vm755_vm10 }
 0xd75   :  { %v751_v35 = vsub.f32 1.0, %v750_v34 }
 0xd77   :  { %v752_v36 = vmul.f32 %v1145_v33, %v751_v35 }
 0xd79   :  { %v753_v37 = vadd.f32 %v1145_v33, %v752_v36 }
 0xd7b   :  { %v757_v40 = vsel %vm756_vm12, %v1145_v33, %v753_v37 }
 0xd7c   :  { %v762_v43 = vsel %vm759_vm13, %v761_v41, %v757_v40 }
 0xd7d   :  { %v765_v45 = vmul.f32 %v762_v43, %v717_v18 }
 0xdc2   :  { %v768_v42 = vpop.permute.xlu2 %767 }
 0xdc3   :  { %v770_v44 = vmul.f32 %v768_v42, %v762_v43 }
 0xdc5   :  { %772 = vrot.lane.b32.xlu0 %v770_v44, %s1238_s25 }
 0xe37   :  { %v773_v46 = vpop.permute.xlu0 %772 }
 0xe38   :  { %v775_v47 = vadd.f32 %v773_v46, %v765_v45 }
 0xe3a   :  { %1146 = vtanh.f32 %v775_v47 }
 0xe40   :  { %v1147_v48 = vpop.eup %1146 }
 0xe41   :  { %778 = vrot.lane.b32.xlu1 %v1147_v48, %s1236_s23 }
 0xeb3   :  { %v779_v50 = vpop.permute.xlu1 %778 }
 0xeb4   :  { %v781_v51 = vmul.f32 %v779_v50, %v762_v43 }
 0xeb6   :  { %v784_v52 = vpack.c.bf16 %v781_v51, %v723_v21 }
 0xeb8   :  { %786 = vrot.lane.b32.xlu2 %v784_v52, %s1239_s26 }
 0xf12   :  { %v787_v53 = vpop.permute.xlu2 %786 }
 0xf13   :  { %1017 = vmatmul.msk.bf16.vlgmr.msrb.gmra.mxu3 %vm670_vm8, %v787_v53 }
 0xf96   :  { %v806_v57 = vpop.f32.mrf.mxu3 }
 0xf97   :  { %v815_v62 = vmul.f32 %v1062_v59, %v806_v57 }
 0xf9e   :  { %v808_v61 = vpop.f32.mrf.mxu3 }
 0xf9f   :  { %v816_v63 = vmul.f32 %v1063_v60, %v808_v61 }
 0xfa1   :  { %v823_v1 = vpack.c.bf16 %v816_v63, %v815_v62 }
 0xfa3   :  { %1030 = vmatmul.msk.bf16.vlgmr.msra.gmra.mxu0 %vm215_vm2, %v823_v1  ;;  %vm878_vm2 = vcmask 41984  }
0x1020   :  { %v854_v0 = vpop.f32.mrf.mxu0 }
0x1021   :  { %v859_v2 = vsel %vm476_vm9, %v854_v0, 0.0 }
0x1022   :  { %v860_v3 = vrot.slane %v859_v2, 4 }
0x1024   :  { %v861_v4 = vadd.f32 %v860_v3, %v859_v2 }
0x1026   :  { %v862_v5 = vrot.slane %v861_v4, 2 }
0x1028   :  { %v856_v6 = vpop.f32.mrf.mxu0  ;;  %v863_v9 = vadd.f32 %v862_v5, %v861_v4 }
0x1029   :  { %v866_v7 = vsel %vm476_vm9, %v856_v6, 0.0 }
0x102a   :  { %v867_v8 = vrot.slane %v866_v7, 4  ;;  %v864_v12 = vrot.slane %v863_v9, 1 }
0x102c   :  { %v868_v10 = vadd.f32 %v867_v8, %v866_v7  ;;  %v865_v16 = vadd.f32 %v864_v12, %v863_v9 }
0x102e   :  { %v869_v11 = vrot.slane %v868_v10, 2 }
0x1030   :  { %v870_v13 = vadd.f32 %v869_v11, %v868_v10 }
0x1032   :  { %v871_v14 = vrot.slane %v870_v13, 1 }
0x1034   :  { %v872_v17 = vadd.f32 %v871_v14, %v870_v13 }
0x1036   :  { %v874_v18 = vsel %vm873_vm14, %v865_v16, %v872_v17 }
0x1037   :  { %v877_v19 = vadd.f32 %v1115_v15, %v874_v18 }
0x1039   :  { %879 = vst.msk [vmem:[#allocation7] sm:$0x3] %vm878_vm2, %v877_v19 }
0x103a   :  { %890 = dma.vmem_to_hbm [thread:$0]  %s886_s28, 32, %s888_s3, [#allocation4]  }
0x103b   :  { %1224 = dma.done.wait [#allocation4], 32  }
0x103c   :  { %1225 = vsyncadd [#allocation4], 4294967264 }
0x103d   :  { %895 = vsyncpa [#allocation3], 1 }
0x103e   :  { %896 = vsyncpa [#allocation6], 1 }
0x103f   :  { %897 = vsyncpa [#allocation4], 1 }

</bundles_post_ra>
